<compile_context>
chip_gen: v6e
topology: v6e:2x2x1
jax: 0.10.0
libtpu: 0.0.40
codegen_flags: <defaults>
</compile_context>

<pallas_src>
import jax
import jax.numpy as jnp
import numpy as np
from jax import lax
from jax.experimental import pallas as pl
from jax.experimental.pallas import tpu as pltpu


def _pick_tile(total, target):
    """Largest tile <= target that divides `total` and is a multiple of 128,
    falling back to the full extent (full-dim blocks are always legal)."""
    if total <= target:
        return total
    t = (target // 128) * 128
    while t >= 128:
        if total % t == 0:
            return t
        t -= 128
    return total


# ----------------------------------------------------------------------------
# Kernel 1: fused conv3x3(s2) + ReLU + conv1x1 on column-major im2col tiles.
#   patches: (N, Cin*9, Ho*Wo)  ->  backbone (N, F, Ho*Wo), logits (N, C, Ho*Wo)
#   Pixels live on lanes, so every load/store is lane-dense.
# ----------------------------------------------------------------------------
def _seg_head_kernel(p_ref, w1_ref, b1_ref, w2_ref, b2_ref, bb_ref, lg_ref):
    p = p_ref[0]                                                   # (K1, TM)
    feat = jnp.dot(w1_ref[...], p,
                   preferred_element_type=jnp.float32) + b1_ref[...]
    feat = jnp.maximum(feat, 0.0)                                  # (F, TM)
    bb_ref[0] = feat                                               # lane-dense
    lg_ref[0] = (jnp.dot(w2_ref[...], feat,
                         preferred_element_type=jnp.float32)
                 + b2_ref[...])                                    # (C, TM)


def seg_head(patches_cm, w1_t, b1_col, w2_t, b2_col, tm):
    N, K1, M = patches_cm.shape
    Fch = w1_t.shape[0]
    C = w2_t.shape[0]
    n_tiles = M // tm
    flops = 2 * N * M * (K1 * Fch + Fch * C)
    bytes_accessed = 4 * (N * M * (K1 + Fch + C)
                          + K1 * Fch + Fch * C + Fch + C)
    return pl.pallas_call(
        _seg_head_kernel,
        out_shape=(jax.ShapeDtypeStruct((N, Fch, M), jnp.float32),
                   jax.ShapeDtypeStruct((N, C, M), jnp.float32)),
        grid=(N, n_tiles),
        in_specs=[pl.BlockSpec((1, K1, tm), lambda n, i: (n, 0, i)),
                  pl.BlockSpec((Fch, K1), lambda n, i: (0, 0)),
                  pl.BlockSpec((Fch, 1), lambda n, i: (0, 0)),
                  pl.BlockSpec((C, Fch), lambda n, i: (0, 0)),
                  pl.BlockSpec((C, 1), lambda n, i: (0, 0))],
        out_specs=(pl.BlockSpec((1, Fch, tm), lambda n, i: (n, 0, i)),
                   pl.BlockSpec((1, C, tm), lambda n, i: (n, 0, i))),
        compiler_params=pltpu.CompilerParams(
            dimension_semantics=("parallel", "parallel")),
        cost_estimate=pl.CostEstimate(flops=flops, transcendentals=0,
                                      bytes_accessed=bytes_accessed),
    )(patches_cm, w1_t, b1_col, w2_t, b2_col)


# ----------------------------------------------------------------------------
# Kernel 2: bilinear upsample (align_corners=True) as two matmuls per plane,
#   batched over all C planes of one image per grid step.
# ----------------------------------------------------------------------------
def _bilinear_kernel(lg_ref, ah_ref, awt_ref, o_ref):
    n_planes = lg_ref.shape[1]
    for c in range(n_planes):                       # static unroll over planes
        x = lg_ref[0, c]                                            # (Ho, Wo)
        tmp = jnp.dot(ah_ref[...], x, preferred_element_type=jnp.float32)
        o_ref[0, c] = jnp.dot(tmp, awt_ref[...],
                              preferred_element_type=jnp.float32)   # (H, W)


def bilinear_upsample(logits_lr, a_h, a_w_t):
    N, C, Ho, Wo = logits_lr.shape
    H = a_h.shape[0]
    W = a_w_t.shape[1]
    flops = 2 * N * C * (H * Ho * Wo + H * Wo * W)
    bytes_accessed = 4 * (N * C * (Ho * Wo + H * W) + H * Ho + Wo * W)
    return pl.pallas_call(
        _bilinear_kernel,
        out_shape=jax.ShapeDtypeStruct((N, C, H, W), jnp.float32),
        grid=(N,),
        in_specs=[pl.BlockSpec((1, C, Ho, Wo), lambda n: (n, 0, 0, 0)),
                  pl.BlockSpec((H, Ho), lambda n: (0, 0)),
                  pl.BlockSpec((Wo, W), lambda n: (0, 0))],
        out_specs=pl.BlockSpec((1, C, H, W), lambda n: (n, 0, 0, 0)),
        compiler_params=pltpu.CompilerParams(
            dimension_semantics=("parallel",)),
        cost_estimate=pl.CostEstimate(flops=flops, transcendentals=0,
                                      bytes_accessed=bytes_accessed),
    )(logits_lr, a_h, a_w_t)


# ----------------------------------------------------------------------------
# Kernel 3: _kld / _entropy regularizers (build_region_weight fused).
#   Tiled over pixels; classes on sublanes, pixels on lanes; global
#   accumulators in VMEM scratch, finalized on the last grid step.
# ----------------------------------------------------------------------------
def _reg_loss_kernel(lg_ref, lbl_ref, kld_ref, ent_ref,
                     kacc, eacc, vacc, iacc):
    n = pl.program_id(0)
    t = pl.program_id(1)

    @pl.when((n == 0) & (t == 0))
    def _():
        kacc[...] = jnp.zeros_like(kacc)
        eacc[...] = jnp.zeros_like(eacc)
        vacc[...] = jnp.zeros_like(vacc)
        iacc[...] = jnp.zeros_like(iacc)

    x = lg_ref[0].astype(jnp.float32)                  # (C, TP)
    n_cls = x.shape[0]
    m = jnp.max(x, axis=0, keepdims=True)              # sublane reduce
    z = x - m
    lse = jnp.log(jnp.sum(jnp.exp(z), axis=0, keepdims=True))
    logp = z - lse                                     # log_softmax over C
    p = jnp.exp(logp)                                  # softmax over C
    valid = (lbl_ref[0] != 255).astype(jnp.float32)    # (1, TP) confident mask

    kacc[...] += jnp.sum((-1.0 / n_cls) * valid * logp,
                         axis=(0, 1), keepdims=True)
    eacc[...] += jnp.sum(-p * (1.0 - valid) * logp,
                         axis=(0, 1), keepdims=True)
    vacc[...] += jnp.sum(valid, axis=(0, 1), keepdims=True)
    iacc[...] += jnp.sum(1.0 - valid, axis=(0, 1), keepdims=True)

    @pl.when((n == pl.num_programs(0) - 1) & (t == pl.num_programs(1) - 1))
    def _():
        # val_num counts all (pixel, class) entries of the region weight (> 0);
        # denominators are global sums, guarded against zero.
        nv = vacc[...] * n_cls
        ni = iacc[...] * n_cls
        kld_ref[...] = jnp.where(nv > 0, kacc[...] / nv, 0.0)
        ent_ref[...] = jnp.where(ni > 0, eacc[...] / ni, 0.0)


def reg_losses(t_logits_nchw, t_plbl, pix_tile=8192):
    N, C, H, W = t_logits_nchw.shape
    hw = H * W
    tp = _pick_tile(hw, pix_tile)
    rows = t_logits_nchw.reshape(N, C, hw)             # free reshape, no transpose
    lbl = t_plbl.reshape(N, 1, hw).astype(jnp.int32)
    kld, ent = pl.pallas_call(
        _reg_loss_kernel,
        out_shape=(jax.ShapeDtypeStruct((1, 1), jnp.float32),
                   jax.ShapeDtypeStruct((1, 1), jnp.float32)),
        grid=(N, hw // tp),
        in_specs=[pl.BlockSpec((1, C, tp), lambda n, t: (n, 0, t)),
                  pl.BlockSpec((1, 1, tp), lambda n, t: (n, 0, t))],
        out_specs=(pl.BlockSpec((1, 1), lambda n, t: (0, 0)),
                   pl.BlockSpec((1, 1), lambda n, t: (0, 0))),
        scratch_shapes=[pltpu.VMEM((1, 1), jnp.float32)] * 4,
        compiler_params=pltpu.CompilerParams(
            dimension_semantics=("arbitrary", "arbitrary")),
    )(rows, lbl)
    return kld[0, 0], ent[0, 0]


# ----------------------------------------------------------------------------
# Glue (pure JAX): column-major im2col, align_corners interp matrices, wrapper.
# ----------------------------------------------------------------------------
def im2col_3x3_s2_cm(x_nchw):
    """3x3 / stride 2 / pad 1 patches in column-major (Cin*9, pixel) layout.

    Returns (N, Cin*9, Ho*Wo): channel*tap on sublanes, output pixels on lanes,
    i.e. exactly the layout the seg_head kernel consumes (no transposes).
    """
    N, Cc, H, W = x_nchw.shape
    Ho, Wo = H // 2, W // 2
    x_pad = jnp.pad(x_nchw, ((0, 0), (0, 0), (1, 1), (1, 1)))
    taps = []
    for dy in range(3):
        for dx in range(3):
            taps.append(x_pad[:, :, dy:dy + 2 * Ho:2, dx:dx + 2 * Wo:2])
    p = jnp.stack(taps, axis=2)                        # (N, Cin, 9, Ho, Wo)
    return p.reshape(N, Cc * 9, Ho * Wo)


def interp_matrix(out_size, in_size):
    """Row-stochastic bilinear weights, align_corners=True."""
    if out_size == 1:
        src = jnp.zeros((1,), jnp.float32)
    else:
        src = jnp.arange(out_size, dtype=jnp.float32) * \
            (in_size - 1) / (out_size - 1)
    lo = jnp.clip(jnp.floor(src).astype(jnp.int32), 0, in_size - 1)
    hi = jnp.minimum(lo + 1, in_size - 1)
    frac = src - lo.astype(jnp.float32)
    rows = jnp.arange(out_size)
    A = jnp.zeros((out_size, in_size), jnp.float32)
    A = A.at[rows, lo].add(1.0 - frac)
    A = A.at[rows, hi].add(frac)
    return A


def self_training_segmentor_forward(params, t_img):
    """Returns {'logits': (N, C, H, W), 'backbone': (N, F, H/2, W/2)}."""
    N, Cin, H, W = t_img.shape
    assert H % 2 == 0 and W % 2 == 0, "stride-2 backbone expects even H, W"
    Ho, Wo = H // 2, W // 2

    patches_cm = im2col_3x3_s2_cm(t_img)               # (N, Cin*9, Ho*Wo)
    tm = _pick_tile(Ho * Wo, 4096)
    backbone_f, logits_f = seg_head(patches_cm, params['w1_t'], params['b1'],
                                    params['w2_t'], params['b2'], tm)
    backbone = backbone_f.reshape(N, -1, Ho, Wo)       # already NCHW (free)
    logits_lr = logits_f.reshape(N, -1, Ho, Wo)        # already NCHW (free)

    a_h = interp_matrix(H, Ho)
    a_w_t = interp_matrix(W, Wo).T
    logits = bilinear_upsample(logits_lr, a_h, a_w_t)
    return {'logits': logits, 'backbone': backbone}


# ----------------------------------------------------------------------------
# Pure-JAX references (for validation only).
# ----------------------------------------------------------------------------
def _forward_ref(w1_conv, b1, w2, b2, t_img):
    N, Cin, H, W = t_img.shape
    f = lax.conv_general_dilated(t_img, w1_conv, window_strides=(2, 2),
                                 padding=((1, 1), (1, 1)),
                                 dimension_numbers=('NCHW', 'OIHW', 'NCHW'))
    f = jnp.maximum(f + b1[None, :, None, None], 0.0)
    lg = jnp.einsum('nfhw,fc->nchw', f, w2) + b2[None, :, None, None]
    a_h = interp_matrix(H, H // 2)
    a_w_t = interp_matrix(W, W // 2).T
    up = jnp.einsum('Hh,nchw,wW->ncHW', a_h, lg, a_w_t)
    return up, f


def _reg_losses_ref(logits, plbl):
    val = (plbl != 255).astype(jnp.float32)[:, None]        # (N,1,H,W)
    w_conf = jnp.ones_like(logits) * val
    w_ign = jnp.ones_like(logits) * (1.0 - val)
    logp = jax.nn.log_softmax(logits, axis=1)
    p = jax.nn.softmax(logits, axis=1)
    C = logits.shape[1]
    kld = jnp.sum(-1.0 / C * w_conf * logp) / jnp.sum(w_conf > 0)
    ent = jnp.sum(-p * w_ign * logp) / jnp.sum(w_ign > 0)
    return kld, ent


if __name__ == "__main__":
    key = jax.random.PRNGKey(0)
    N, Cin, H, W = 2, 3, 16, 16
    Cfeat, nclass = 16, 8

    k1, k2, k3, k4, k5, k6, k7 = jax.random.split(key, 7)
    t_img = jax.random.normal(k1, (N, Cin, H, W), jnp.float32)
    w1_conv = jax.random.normal(k2, (Cfeat, Cin, 3, 3), jnp.float32) * 0.1
    b1 = jax.random.normal(k3, (Cfeat,), jnp.float32) * 0.1
    w2 = jax.random.normal(k4, (Cfeat, nclass), jnp.float32) * 0.1
    b2 = jax.random.normal(k5, (nclass,), jnp.float32) * 0.1
    # pseudo labels with ~30% ignored (255) pixels
    lbl = jax.random.randint(k6, (N, H, W), 0, nclass, jnp.int32)
    ign = jax.random.uniform(k7, (N, H, W)) < 0.3
    t_plbl = jnp.where(ign, 255, lbl).astype(jnp.int32)

    params = {'w1_t': w1_conv.reshape(Cfeat, Cin * 9),   # (F, Cin*9), tap order
              'b1': b1.reshape(Cfeat, 1),                # (F, 1)
              'w2_t': w2.T,                              # (C, F)
              'b2': b2.reshape(nclass, 1)}               # (C, 1)

    out = self_training_segmentor_forward(params, t_img)
    out = jax.tree_util.tree_map(jax.block_until_ready, out)
    kld, ent = reg_losses(out['logits'], t_plbl)
    jax.block_until_ready((kld, ent))

    # --- validate against pure-JAX references ---
    logits_ref, backbone_ref = _forward_ref(w1_conv, b1, w2, b2, t_img)
    np.testing.assert_allclose(np.asarray(out['backbone']),
                               np.asarray(backbone_ref), rtol=1e-3, atol=1e-4)
    np.testing.assert_allclose(np.asarray(out['logits']),
                               np.asarray(logits_ref), rtol=1e-3, atol=1e-4)
    kld_ref, ent_ref = _reg_losses_ref(out['logits'], t_plbl)
    np.testing.assert_allclose(np.asarray(kld), np.asarray(kld_ref),
                               rtol=1e-3, atol=1e-5)
    np.testing.assert_allclose(np.asarray(ent), np.asarray(ent_ref),
                               rtol=1e-3, atol=1e-5)

    print("KERNEL_OK")
</pallas_src>

<mosaic_0001>
module attributes {stable_mosaic.version = 11 : i64} {
  func.func @_seg_head_kernel(%arg0: i32, %arg1: i32, %arg2: memref<1x27x64xf32, #tpu.memory_space<vmem>>, %arg3: memref<16x27xf32, #tpu.memory_space<vmem>>, %arg4: memref<16x1xf32, #tpu.memory_space<vmem>>, %arg5: memref<8x16xf32, #tpu.memory_space<vmem>>, %arg6: memref<8x1xf32, #tpu.memory_space<vmem>>, %arg7: memref<1x16x64xf32, #tpu.memory_space<vmem>>, %arg8: memref<1x8x64xf32, #tpu.memory_space<vmem>>) attributes {dimension_semantics = [#tpu.dimension_semantics<parallel>, #tpu.dimension_semantics<parallel>], iteration_bounds = array<i64: 2, 1>, scalar_prefetch = 0 : i64, scratch_operands = 0 : i64, tpu.core_type = #tpu.core_type<tc>, window_params = [{transform_indices = @transform_0, window_bounds = array<i64: 1, 27, 64>}, {pipeline_mode = #tpu.pipeline_mode<synchronous>, transform_indices = @transform_1, window_bounds = array<i64: 16, 27>}, {pipeline_mode = #tpu.pipeline_mode<synchronous>, transform_indices = @transform_2, window_bounds = array<i64: 16, 1>}, {pipeline_mode = #tpu.pipeline_mode<synchronous>, transform_indices = @transform_3, window_bounds = array<i64: 8, 16>}, {pipeline_mode = #tpu.pipeline_mode<synchronous>, transform_indices = @transform_4, window_bounds = array<i64: 8, 1>}, {transform_indices = @transform_5, window_bounds = array<i64: 1, 16, 64>}, {transform_indices = @transform_6, window_bounds = array<i64: 1, 8, 64>}]} {
    %c0 = arith.constant 0 : index
    %c0_0 = arith.constant 0 : index
    %c0_1 = arith.constant 0 : index
    %0 = vector.load %arg2[%c0, %c0_0, %c0_1] : memref<1x27x64xf32, #tpu.memory_space<vmem>>, vector<1x27x64xf32>
    %1 = vector.shape_cast %0 : vector<1x27x64xf32> to vector<27x64xf32>
    %c0_2 = arith.constant 0 : index
    %c0_3 = arith.constant 0 : index
    %2 = vector.load %arg3[%c0_2, %c0_3] : memref<16x27xf32, #tpu.memory_space<vmem>>, vector<16x27xf32>
    %cst = arith.constant dense<0.000000e+00> : vector<16x64xf32>
    %3 = tpu.matmul %2, %1, %cst {dimension_numbers = #tpu.dot_dimension_numbers<[1], [0], [0], [1], [0, 0, 1, 1], [], []>} : vector<16x27xf32>, vector<27x64xf32>, vector<16x64xf32> -> vector<16x64xf32>
    %c0_4 = arith.constant 0 : index
    %c0_5 = arith.constant 0 : index
    %4 = vector.load %arg4[%c0_4, %c0_5] : memref<16x1xf32, #tpu.memory_space<vmem>>, vector<16x1xf32>
    %5 = vector.broadcast %4 : vector<16x1xf32> to vector<16x64xf32>
    %6 = arith.addf %3, %5 : vector<16x64xf32>
    %cst_6 = arith.constant 0.000000e+00 : f32
    %7 = vector.broadcast %cst_6 : f32 to vector<16x64xf32>
    %8 = arith.maximumf %6, %7 : vector<16x64xf32>
    %c0_7 = arith.constant 0 : index
    %c0_8 = arith.constant 0 : index
    %c0_9 = arith.constant 0 : index
    %9 = vector.load %arg7[%c0_7, %c0_8, %c0_9] : memref<1x16x64xf32, #tpu.memory_space<vmem>>, vector<1x16x64xf32>
    %10 = vector.shape_cast %9 : vector<1x16x64xf32> to vector<16x64xf32>
    %11 = vector.shape_cast %8 : vector<16x64xf32> to vector<1x16x64xf32>
    tpu.vector_store %arg7[%c0_7, %c0_8, %c0_9], %11 {strides = array<i32>} : memref<1x16x64xf32, #tpu.memory_space<vmem>>, vector<1x16x64xf32>,
    %c0_10 = arith.constant 0 : index
    %c0_11 = arith.constant 0 : index
    %12 = vector.load %arg5[%c0_10, %c0_11] : memref<8x16xf32, #tpu.memory_space<vmem>>, vector<8x16xf32>
    %cst_12 = arith.constant dense<0.000000e+00> : vector<8x64xf32>
    %13 = tpu.matmul %12, %8, %cst_12 {dimension_numbers = #tpu.dot_dimension_numbers<[1], [0], [0], [1], [0, 0, 1, 1], [], []>} : vector<8x16xf32>, vector<16x64xf32>, vector<8x64xf32> -> vector<8x64xf32>
    %c0_13 = arith.constant 0 : index
    %c0_14 = arith.constant 0 : index
    %14 = vector.load %arg6[%c0_13, %c0_14] : memref<8x1xf32, #tpu.memory_space<vmem>>, vector<8x1xf32>
    %15 = vector.broadcast %14 : vector<8x1xf32> to vector<8x64xf32>
    %16 = arith.addf %13, %15 : vector<8x64xf32>
    %c0_15 = arith.constant 0 : index
    %c0_16 = arith.constant 0 : index
    %c0_17 = arith.constant 0 : index
    %17 = vector.load %arg8[%c0_15, %c0_16, %c0_17] : memref<1x8x64xf32, #tpu.memory_space<vmem>>, vector<1x8x64xf32>
    %18 = vector.shape_cast %17 : vector<1x8x64xf32> to vector<8x64xf32>
    %19 = vector.shape_cast %16 : vector<8x64xf32> to vector<1x8x64xf32>
    tpu.vector_store %arg8[%c0_15, %c0_16, %c0_17], %19 {strides = array<i32>} : memref<1x8x64xf32, #tpu.memory_space<vmem>>, vector<1x8x64xf32>,
    return
  }
  func.func @transform_0(%arg0: i32, %arg1: i32) -> (i32, i32, i32) {
    %c0_i32 = arith.constant 0 : i32
    %c0_i32_0 = arith.constant 0 : i32
    return %arg0, %c0_i32, %arg1 : i32, i32, i32
  }
  func.func @transform_1(%arg0: i32, %arg1: i32) -> (i32, i32) {
    %c0_i32 = arith.constant 0 : i32
    %c0_i32_0 = arith.constant 0 : i32
    %c0_i32_1 = arith.constant 0 : i32
    return %c0_i32, %c0_i32_0 : i32, i32
  }
  func.func @transform_2(%arg0: i32, %arg1: i32) -> (i32, i32) {
    %c0_i32 = arith.constant 0 : i32
    %c0_i32_0 = arith.constant 0 : i32
    %c0_i32_1 = arith.constant 0 : i32
    return %c0_i32, %c0_i32_0 : i32, i32
  }
  func.func @transform_3(%arg0: i32, %arg1: i32) -> (i32, i32) {
    %c0_i32 = arith.constant 0 : i32
    %c0_i32_0 = arith.constant 0 : i32
    %c0_i32_1 = arith.constant 0 : i32
    return %c0_i32, %c0_i32_0 : i32, i32
  }
  func.func @transform_4(%arg0: i32, %arg1: i32) -> (i32, i32) {
    %c0_i32 = arith.constant 0 : i32
    %c0_i32_0 = arith.constant 0 : i32
    %c0_i32_1 = arith.constant 0 : i32
    return %c0_i32, %c0_i32_0 : i32, i32
  }
  func.func @transform_5(%arg0: i32, %arg1: i32) -> (i32, i32, i32) {
    %c0_i32 = arith.constant 0 : i32
    %c0_i32_0 = arith.constant 0 : i32
    return %arg0, %c0_i32, %arg1 : i32, i32, i32
  }
  func.func @transform_6(%arg0: i32, %arg1: i32) -> (i32, i32, i32) {
    %c0_i32 = arith.constant 0 : i32
    %c0_i32_0 = arith.constant 0 : i32
    return %arg0, %c0_i32, %arg1 : i32, i32, i32
  }
}

</mosaic_0001>

<bundles_post_ra>
// kernel: tpu_custom_call.1
= control target key start
LH: loop header
LB: loop body
LE: loop exit
PB: predicated region body
PF: predicated region fallthrough
CT: control target
= control target key end

     0   :  { %s1054_s0 = inlined_call_operand.vmem [shape: f32[2,27,64], index: 0, kind: input, shape index: {}]   ;;  %s1055_s1 = inlined_call_operand.vmem [shape: f32[16,27], index: 1, kind: input, shape index: {}]   ;;  %s1056_s2 = inlined_call_operand.vmem [shape: f32[16,1], index: 2, kind: input, shape index: {}]   ;;  %s1057_s3 = inlined_call_operand.vmem [shape: f32[8,16], index: 3, kind: input, shape index: {}]   ;;  %s1058_s4 = inlined_call_operand.vmem [shape: f32[8,1], index: 4, kind: input, shape index: {}]   ;;  %s1059_s5 = inlined_call_operand.hbm [shape: f32[2,16,64], index: 5, kind: output, shape index: {0}]   ;;  %s1060_s6 = inlined_call_operand.hbm [shape: f32[2,8,64], index: 6, kind: output, shape index: {1}]  }
   0x1   :  { %1061 = sst [smem:[#allocation8_spill]] %s1054_s0 }
   0x2   :  { %12 = vsyncpa [#allocation3], 0 }
   0x3   :  { %14 = vsyncpa [#allocation3 + $0x1], 0 }
   0x4   :  { %15 = vsyncpa [#allocation5], 0 }
   0x5   :  { %17 = vsyncpa [#allocation5 + $0x1], 0  ;;  %s890_s21 = smov 0   ;;  %s892_s22 = smov 0  }
   0x6   :  { %s894_s23 = smov 0   ;;  %s896_s24 = smov 0  }
   0x7   :  { %s898_s25 = smov 0   ;;  %s900_s26 = smov 0  }
   0x8 LB: > { %s624_s27 = sadd.s32 4294967295, %s846_s26   ;;  %s625_s28 = sadd.s32 4294967294, %s846_s26   ;;  %s846_s26 = sphi %s900_s26, %s23_s26   ;;  %s842_s25 = sphi %s898_s25, %s1069_s25   ;;  %s838_s24 = sphi %s896_s24, %s1068_s24   ;;  %s834_s23 = sphi %s894_s23, %s1067_s23   ;;  %s830_s22 = sphi %s892_s22, %s1066_s22   ;;  %s826_s21 = sphi %s890_s21, %s1065_s21  }
   0x9   : > { %s35_s29 = sadd.s32 1, %s842_s25  ;;  %s156_s30 = sadd.s32 1, %s834_s23 }
   0xa   : > { %p37_p0 = scmp.ge.s32.totalorder %s35_s29, 2  ;;  %p166_p1 = scmp.ne.s32.totalorder %s834_s23, %s830_s22 }
   0xb   : > { %p167_p2 = scmp.eq.s32.totalorder %s624_s27, 1  ;;  %p172_p3 = scmp.ne.s32.totalorder %s830_s22, %s826_s21 }
   0xc   : > { %s1071_s29 = smov (%p37_p0, %s35_s29), 0  ;;  %p173_p5 = scmp.eq.s32.totalorder %s625_s28, 1 }
   0xd   : > { %p930_p4 = por %p167_p2, %p166_p1  ;;  %s151_s8 = ssub.s32 %s842_s25, %s1071_s29 }
   0xe   : > { %p628_p6 = scmp.ge.s32.totalorder %s846_s26, 1  ;;  %p154_p7 = scmp.eq.s32.totalorder %s151_s8, 0 }
   0xf   : > { %p937_p8 = por %p173_p5, %p172_p3  ;;  %p242_p9 = scmp.lt.s32.totalorder %s846_s26, 3 }
  0x10   : > { %s943_s10 = scalar_select %p154_p7, %s834_s23, %s156_s30  }
  0x11   : > { %p243_p10 = pnand %p628_p6, %p242_p9 }
  0x12   : > { %p280_p11 = scmp.lt.s32.totalorder (!%p243_p10), %s838_s24, 1  ;;  %s1064_s0 = sld [smem:[#allocation8_spill]] (!%p243_p10) }
  0x13   : > { %246 = sbr.rel (%p243_p10) target bundleno = 445 (0x1bd), region = 40  ;;  %s968_s12 = sand.u32 (!%p243_p10), 1, %s830_s22  }
  0x14   : > { %s629_s13 = sshll.u32 (!%p243_p10), %s968_s12, 4  ;;  %s480_s28 = scalar_lea.sflag (!%p243_p10), [#allocation3], %s968_s12 }
  0x15   : > { %s272_s14 = scalar_lea.vmem (!%p243_p10), [#allocation2], %s629_s13  ;;  %s851_s8 = smov (!%p243_p10), [#allocation2]  }
  0x16   : > { %s499_s17 = sshll.u32 (!%p243_p10), %s272_s14, 4  ;;  %s744_s11 = sshll.u32 (!%p243_p10), %s851_s8, 4  ;;  %s976_s17 = int_to_ptr.vmem [resolvable:$true] %s499_s17  ;;  %s745_s11 = int_to_ptr.vmem [resolvable:$false] %s744_s11 }
  0x17   : > { %s740_s30 = scalar_lea.vmem (!%p243_p10), %s976_s17, 256  ;;  %s746_s13 = scalar_lea.vmem (!%p243_p10), %s745_s11, 512 }
  0x18   : > { %v292_v0 = vld [vmem:[%s1055_s1] sm:$0xff]  ;;  %vm306_vm0 = vcmask 220160   ;;  %v848_v1 = vmov 0   ;;  %v295_v2 = vld [vmem:[%s1056_s2 + $0x8] sm:$0xff]  ;;  %s281_s15 = scalar_select %p280_p11, %s838_s24, 1  ;;  %vm313_vm1 = vcmask 1042432  }
  0x19   : > { %663 = vmatprep.mubr.msk.f32.mxu0 %vm306_vm0, %v292_v0  ;;  %738 = vset.pattern.permute.xlu0 %v848_v1  ;;  %v294_v3 = vld [vmem:[%s1056_s2] sm:$0xff]  ;;  %v293_v8 = vld [vmem:[%s1055_s1 + $0x8] sm:$0xff]  ;;  %v849_v9 = vmov 0.0   ;;  %vm850_vm2 = vmmov 0   ;;  %vm394_vm3 = vcmask 523264   ;;  %vm404_vm4 = vcmask 130048   ;;  %p741_p12 = scmp.ne.s32.totalorder %s976_s17, %s740_s30  ;;  %p747_p1 = scmp.lt.s32.totalorder %s976_s17, %s745_s11 }
  0x1a   : > { %303 = vperm.xlu0 %738, %v295_v2   ;;  %739 = vset.pattern.permute.xlu1 %v848_v1  ;;  %s644_s18 = sshll.u32 %s281_s15, 5  ;;  %v398_v10 = vld [vmem:[%s1058_s4] sm:$0xff]  ;;  %p748_p2 = scmp.lt.s32.totalorder %s746_s13, %s740_s30 }
  0x1b   : > { %s287_s27 = scalar_lea.vmem %s1064_s0, %s644_s18  ;;  %666 = vmatprep.subr.mxu1 %v849_v9  ;;  %670 = vmatprep.mubr.msk.f32.mxu1 %vm850_vm2, %v849_v9  ;;  %v397_v19 = vld [vmem:[%s1057_s3] sm:$0xff]  ;;  %s645_s18 = sshll.u32 %s838_s24, 8 }
  0x1c   : > { %v291_v4 = vld [vmem:[%s287_s27 + $0x18] sm:$0x7]  ;;  %v290_v5 = vld [vmem:[%s287_s27 + $0x10] sm:$0xff]  ;;  %v289_v6 = vld [vmem:[%s287_s27 + $0x8] sm:$0xff]  ;;  %401 = vperm.xlu1 %739, %v398_v10   ;;  %p742_p13 = pnand %p741_p12, %p930_p4  ;;  %p749_p3 = por %p748_p2, %p747_p1 }
  0x1d   : > { %655 = vmatprep.subr.msk.mxu0 %vm313_vm1, %v291_v4  ;;  %v288_v7 = vld [vmem:[%s287_s27] sm:$0xff]  ;;  %s982_s27 = scalar_lea.hbm %s1059_s5, %s645_s18 }
  0x1e   : > { %298 = vperm.xlu0 %738, %v294_v3   ;;  %656 = vmatpush3.msk.msra.mxu0 %vm313_vm1, %v291_v4  ;;  %p743_p0 = pneg %p742_p13 }
  0x1f   : > { %657 = vmatprep.subr.mxu0 %v290_v5 }
  0x20   : > { %658 = vmatpush3.msra.mxu0 %v290_v5  ;;  %p750_p5 = pnand %p749_p3, %p743_p0 }
  0x21   : > { %659 = vmatprep.subr.mxu0 %v289_v6 }
  0x22   : > { %660 = vmatpush3.msra.mxu0 %v289_v6 }
  0x23   : > { %661 = vmatprep.subr.mxu0 %v288_v7 }
  0x24   : > { %662 = vmatpush3.msra.mxu0 %v288_v7 }
  0x25   : > { %664 = vmatmul.mubr.msk.f32.vlgmr.msra.gmra.mxu0 %vm306_vm0, %v293_v8 }
  0x95   : > { %v304_v11 = vpop.permute.xlu0 %303 }
  0x99   : > { %v299_v14 = vpop.permute.xlu0 %298 }
  0xe5   : > { %v665_v12 = vpop.f32.mrf.mxu0 }
  0xe6   : > { %v389_v13 = vadd.f32 %v665_v12, %v304_v11 }
  0xe7   : > { %v383_v15 = vpop.f32.mrf.mxu0 }
  0xe8   : > { %v393_v16 = vmax.f32 %v389_v13, 0.0  ;;  %v384_v17 = vadd.f32 %v383_v15, %v299_v14 }
  0xea   : > { %396 = vst.msk [vmem:[%s272_s14 + $0x8] sm:$0xff] %vm394_vm3, %v393_v16  ;;  %v392_v18 = vmax.f32 %v384_v17, 0.0  ;;  %667 = vmatpush3.msra.mxu1 %v393_v16 }
  0xeb   : > { %668 = vmatprep.subr.mxu1 %v849_v9 }
  0xec   : > { %395 = vst.msk [vmem:[%s272_s14] sm:$0xff] %vm394_vm3, %v392_v18  ;;  %669 = vmatpush3.msra.mxu1 %v392_v18 }
  0xed   : > { %671 = vmatmul.mubr.msk.f32.vlgmr.msra.gmra.mxu1 %vm404_vm4, %v397_v19 }
  0xee   : > { %753 = shalt.err (!%p750_p5)
}
  0xef   : > { %s754_s14 = scalar_lea.hbm %s982_s27, 256  ;;  %s758_s18 = scalar_lea.hbm %s1059_s5, 512 }
  0xf0   : > { %p755_p6 = scmp.ne.s32.totalorder %s982_s27, %s754_s14  ;;  %p759_p10 = scmp.lt.s32.totalorder %s982_s27, %s1059_s5 }
  0xf1   : > { %p760_p11 = scmp.lt.s32.totalorder %s758_s18, %s754_s14 }
  0xf2   : > { %p756_p7 = pnand %p755_p6, %p930_p4 }
  0xf3   : > { %p761_p12 = por %p760_p11, %p759_p10 }
  0xf4   : > { %p757_p9 = pneg %p756_p7 }
  0xf6   : > { %p762_p13 = pnand %p761_p12, %p757_p9 }
  0xf8   : > { %765 = shalt.err (!%p762_p13)
}
  0xf9   : > { %s852_s30 = smov 128   ;;  %s853_s8 = smov 8   ;;  %v402_v20 = vpop.permute.xlu1 %401 }
  0xfa   : > { %673 = dma.vmem_to_hbm [thread:$0]  (%p930_p4), %s976_s17, 256, %s982_s27, %s480_s28, %s852_s30, %s852_s30, %s853_s8  }
  0xfb   : > { %s630_s11 = sshll.u32 %s968_s12, 3  ;;  %s641_s13 = sshll.u32 %s838_s24, 7 }
  0xfc   : > { %s279_s14 = scalar_lea.vmem [#allocation4], %s630_s11  ;;  %s1012_s19 = scalar_lea.hbm %s1060_s6, %s641_s13 }
  0xfd   : > { %s516_s15 = sshll.u32 %s279_s14, 4  ;;  %s485_s20 = scalar_lea.sflag [#allocation5], %s968_s12  ;;  %s517_s15 = int_to_ptr.vmem [resolvable:$true] %s516_s15 }
  0xfe   : > { %s766_s0 = scalar_lea.vmem %s517_s15, 128  ;;  %s854_s24 = smov [#allocation4]  }
  0xff   : > { %p767_p0 = scmp.ne.s32.totalorder %s517_s15, %s766_s0  ;;  %s770_s17 = sshll.u32 %s854_s24, 4  ;;  %s771_s17 = int_to_ptr.vmem [resolvable:$false] %s770_s17 }
 0x100   : > { %s772_s27 = scalar_lea.vmem %s771_s17, 256  ;;  %p773_p3 = scmp.lt.s32.totalorder %s517_s15, %s771_s17 }
 0x101   : > { %p768_p1 = pnand %p767_p0, %p930_p4  ;;  %p774_p5 = scmp.lt.s32.totalorder %s772_s27, %s766_s0 }
 0x103   : > { %p769_p2 = pneg %p768_p1  ;;  %p775_p6 = por %p774_p5, %p773_p3 }
 0x105   : > { %p776_p7 = pnand %p775_p6, %p769_p2 }
 0x1ad   : > { %v474_v21 = vpop.f32.mrf.mxu1 }
 0x1ae   : > { %v475_v22 = vadd.f32 %v474_v21, %v402_v20 }
 0x1af   : > { %v672_v23 = vpop.f32.mrf.mxu1 }
 0x1b0   : > { %478 = vst.msk [vmem:[%s279_s14] sm:$0xff] %vm394_vm3, %v475_v22 }
 0x1b1   : > { %779 = shalt.err (!%p776_p7)
}
 0x1b2   : > { %s780_s28 = scalar_lea.hbm %s1012_s19, 128  ;;  %s784_s8 = scalar_lea.hbm %s1060_s6, 256 }
 0x1b3   : > { %p781_p9 = scmp.ne.s32.totalorder %s1012_s19, %s780_s28  ;;  %p785_p12 = scmp.lt.s32.totalorder %s1012_s19, %s1060_s6 }
 0x1b4   : > { %p786_p13 = scmp.lt.s32.totalorder %s784_s8, %s780_s28 }
 0x1b5   : > { %p782_p10 = pnand %p781_p9, %p930_p4 }
 0x1b6   : > { %p787_p0 = por %p786_p13, %p785_p12 }
 0x1b7   : > { %p783_p11 = pneg %p782_p10 }
 0x1b9   : > { %p788_p1 = pnand %p787_p0, %p783_p11 }
 0x1bb   : > { %791 = shalt.err (!%p788_p1)
}
 0x1bc   : > { %674 = dma.vmem_to_hbm [thread:$0]  (%p930_p4), %s517_s15, 128, %s1012_s19, %s485_s20  }
 0x1bd PF: > { %p684_p2 = scmp.ge.s32.totalorder %s846_s26, 2  ;;  %s528_s0 = sand.u32 1, %s826_s21  }
 0x1be   : > { %s529_s14 = scalar_lea.sflag [#allocation3], %s528_s0 }
 0x1bf   : > { %p678_p3 = pnand %p684_p2, %p937_p8 }
 0x1c1   : > { %p679_p5 = pneg %p678_p3 }
 0x1c3   : > { %817 = dma.done.wait (%p679_p5), %s529_s14, 256  }
 0x1c4   : > { %819 = vsyncadd (%p679_p5), %s529_s14, 4294967040  ;;  %s538_s16 = scalar_lea.sflag [#allocation5], %s528_s0 }
 0x1c5   : > { %821 = dma.done.wait (%p679_p5), %s538_s16, 128  }
 0x1c6   : > { %823 = vsyncadd (%p679_p5), %s538_s16, 4294967168  ;;  %s23_s26 = sadd.s32 1, %s846_s26   ;;  %s1065_s21 = smov %s830_s22 }
 0x1c7   : > { %p20_p6 = scmp.ge.s32.totalorder %s23_s26, 4   ;;  %s1066_s22 = smov %s834_s23 }
 0x1c8   : > { %s1067_s23 = smov %s943_s10  ;;  %s1068_s24 = smov %s842_s25 }
 0x1c9   : > { %s1069_s25 = smov %s1071_s29  ;;  %22 = sbr.rel (!%p20_p6) target bundleno = 8 (0x8), region = 92 }
 0x1ce   :  { %543 = vsyncpa [#allocation3], 1 }
 0x1cf   :  { %545 = vsyncpa [#allocation3 + $0x1], 1 }
 0x1d0   :  { %546 = vsyncpa [#allocation5], 1 }
 0x1d1   :  { %548 = vsyncpa [#allocation5 + $0x1], 1 }

</bundles_post_ra>
